<compile_context>
chip_gen: v6e
topology: v6e:2x2x1
jax: 0.10.0
libtpu: 0.0.40
codegen_flags: <defaults>
</compile_context>

<pallas_src>
import functools
import math

import jax
import jax.numpy as jnp
from jax import lax
from jax.experimental import pallas as pl
from jax.experimental.pallas import tpu as pltpu


# ----------------------------------------------------------------------------
# Fused FSU kernel (per batch element); rows are in [t][j] (time-major-within-
# chunk) order: kernel row p = t*NC + j  <->  sequence position s = j*C + t.
# ----------------------------------------------------------------------------
def _fsu_kernel(afs_ref, x_ref, wf_ref, bsk_ref, lam_ref, lamc_ref,
                lampr_ref, lampi_ref, h0_ref, w1_ref, b1_ref, w2_ref, b2_ref,
                g_ref, beta_ref,
                o_ref,
                z_scr, locr_scr, cr_scr, ci_scr, gpr_scr, gpi_scr,
                *, C, NC, H, eps, compute_dtype):
    cd = compute_dtype

    def mm(a, b):
        return jnp.dot(a.astype(cd), b.astype(cd),
                       preferred_element_type=jnp.float32)

    # --- fused projection [skip | delta*B_real | delta*B_img]: one MXU pass,
    #     result streamed straight into VMEM scratch (no value re-copy).
    #     NOTE: at H=128 the 256-wide MXU on v6e/v7x is underfilled; the 3H
    #     fused N dimension is the mitigation available at this model size.
    z_scr[...] = mm(x_ref[0], wf_ref[...])                       # (S, 3H) f32

    # broadcasts hoisted out of the scan loop (JAX does not CSE them per-iter)
    lam_r = jnp.broadcast_to(lam_ref[0:1, :], (NC, H))
    lam_i = jnp.broadcast_to(lam_ref[1:2, :], (NC, H))

    # --- pass 1: intra-chunk scan, all NC chunks vectorized, register carry.
    #     Drive reads and local-prefix stores are contiguous (NC, H) slabs.
    #     Only the REAL local prefix is stored (Im carry lives in registers).
    def p1_body(t, carry):
        sr, si = carry
        base = pl.multiple_of(t * NC, NC)
        br = z_scr[pl.ds(base, NC), pl.ds(H, H)]                 # Re(Bx) slab
        bi = z_scr[pl.ds(base, NC), pl.ds(2 * H, H)]             # Im(Bx) slab
        nr = lam_r * sr - lam_i * si + br
        ni = lam_r * si + lam_i * sr + bi
        locr_scr[pl.ds(base, NC), :] = nr                        # Re only
        return nr, ni

    zero = jnp.zeros((NC, H), jnp.float32)
    sr, si = lax.fori_loop(0, C, p1_body, (zero, zero))
    cr_scr[...] = sr                                             # chunk carries
    ci_scr[...] = si

    # --- pass 2: short serial scan over the NC chunk carries ((1, H) state),
    #     results written to (NC, H) scratch (no Python-list vreg spills).
    lamc_r = lamc_ref[0:1, :]                                    # lam^C
    lamc_i = lamc_ref[1:2, :]
    h0r = h0_ref[0:1, :]
    h0i = h0_ref[1:2, :]
    gpr_scr[0:1, :] = h0r                                        # G_prev[0] = h0
    gpi_scr[0:1, :] = h0i

    def p2_body(j, carry):
        gr, gi = carry
        br = cr_scr[pl.ds(j - 1, 1), :]
        bi = ci_scr[pl.ds(j - 1, 1), :]
        ngr = lamc_r * gr - lamc_i * gi + br
        ngi = lamc_r * gi + lamc_i * gr + bi
        gpr_scr[pl.ds(j, 1), :] = ngr
        gpi_scr[pl.ds(j, 1), :] = ngi
        return ngr, ngi

    lax.fori_loop(1, NC, p2_body, (h0r, h0i))

    # --- pass 3: h[p] = loc[p] + Re(lam^{t+1} * G_prev[j]), contiguous slabs,
    #     updated in place in locr_scr (which then feeds the FF matmul).
    gr_all = gpr_scr[...]                                        # (NC, H)
    gi_all = gpi_scr[...]

    def p3_body(t, c):
        base = pl.multiple_of(t * NC, NC)
        lr = lampr_ref[pl.ds(t, 1), :]                           # Re(lam^{t+1})
        li = lampi_ref[pl.ds(t, 1), :]
        locr_scr[pl.ds(base, NC), :] = (locr_scr[pl.ds(base, NC), :]
                                        + lr * gr_all - li * gi_all)
        return c

    lax.fori_loop(0, C, p3_body, 0)

    # --- feature_ff: Linear -> ReLU -> (Dropout = identity) -> Linear
    f = mm(locr_scr[...], w1_ref[...]) + b1_ref[...]
    f = jnp.maximum(f, 0.0)
    # TODO(synk): nn.Dropout treated as identity (eval mode).
    f = mm(f, w2_ref[...]) + b2_ref[...]

    # --- mix with skip branch + LayerNorm (eps = 1e-6, as in the module)
    afs = afs_ref[0, 0]                                          # sigmoid(alpha)
    y = z_scr[:, 0:H] + bsk_ref[...]                             # skip branch
    zm = afs * f + (1.0 - afs) * y
    mean = jnp.mean(zm, axis=-1, keepdims=True)
    var = jnp.mean(jnp.square(zm - mean), axis=-1, keepdims=True)
    zn = (zm - mean) * lax.rsqrt(var + eps)
    o_ref[0] = (zn * g_ref[...] + beta_ref[...]).astype(o_ref.dtype)


# ----------------------------------------------------------------------------
# Wrapper
# ----------------------------------------------------------------------------
def _choose_chunk(S):
    """Pick (C, NC) with C*NC == S minimizing serial depth C + NC, preferring
    NC that is a multiple of 8 (sublane-aligned scan state / stores)."""
    best, best_aligned = None, None
    for c in range(1, S + 1):
        if S % c:
            continue
        nc = S // c
        cost = c + nc
        if best is None or cost < best[0]:
            best = (cost, c, nc)
        if nc % 8 == 0 and (best_aligned is None or cost < best_aligned[0]):
            best_aligned = (cost, c, nc)
    chosen = best_aligned if best_aligned is not None else best
    return chosen[1], chosen[2]


def fsu_forward(params, x, *, compute_dtype=jnp.bfloat16):
    """FSU.forward for x of shape (B, S, Hin).  Matmuls run in compute_dtype
    (default bf16, f32 accumulation); the LRU recurrence stays in f32."""
    B, S, Hin = x.shape
    H = params["ln_g"].shape[0]
    C, NC = _choose_chunk(S)

    # ---- host-side parameter prep (fused by XLA, negligible vs the kernel)
    nu, theta, delta = params["nu"], params["theta"], params["delta"]
    lam_mod = jnp.exp(-jnp.exp(nu))
    lam_r = lam_mod * jnp.cos(theta)
    lam_i = lam_mod * jnp.sin(theta)
    lam_ri = jnp.stack([lam_r, lam_i], axis=0)                     # (2, H)

    k = jnp.arange(1, C + 1, dtype=jnp.float32)[:, None]           # (C, 1)
    mod_k = jnp.exp(-k * jnp.exp(nu)[None, :])                     # |lam|^k
    lamp_r = mod_k * jnp.cos(k * theta[None, :])                   # Re(lam^k)
    lamp_i = mod_k * jnp.sin(k * theta[None, :])                   # Im(lam^k)
    lamc_ri = jnp.stack([lamp_r[-1], lamp_i[-1]], axis=0)          # lam^C

    h0_ri = jnp.stack([params["h0_real"], params["h0_img"]], axis=0)

    # fused weight: one pass over x for skip + Re/Im drive, delta folded in;
    # matmul weights cast to compute_dtype (bf16 by default).
    wf = jnp.concatenate([params["skip"]["w"],
                          params["B_real"] * delta[None, :],
                          params["B_img"] * delta[None, :]],
                         axis=1).astype(compute_dtype)             # (Hin, 3H)
    w1 = params["ff1"]["w"].astype(compute_dtype)
    w2 = params["ff2"]["w"].astype(compute_dtype)

    afs = jax.nn.sigmoid(params["alpha"]).reshape(1, 1).astype(jnp.float32)
    bsk = params["skip"]["b"].reshape(1, H)
    b1 = params["ff1"]["b"].reshape(1, H)
    b2 = params["ff2"]["b"].reshape(1, H)
    ln_g = params["ln_g"].reshape(1, H)
    ln_b = params["ln_b"].reshape(1, H)

    # Host-side layout plumbing: reorder rows time-major-within-chunk so every
    # per-step scan access inside the kernel is a contiguous (NC, H) slab.
    # Inverse permutation is applied to the kernel output below.
    if C > 1 and NC > 1:
        xk = x.reshape(B, NC, C, Hin).transpose(0, 2, 1, 3).reshape(B, S, Hin)
    else:
        xk = x                                                     # identity

    const = lambda shape: pl.BlockSpec(shape, lambda b: tuple(0 for _ in shape))

    fsu = pl.pallas_call(
        functools.partial(_fsu_kernel, C=C, NC=NC, H=H, eps=1e-6,
                          compute_dtype=compute_dtype),
        out_shape=jax.ShapeDtypeStruct((B, S, H), x.dtype),
        grid=(B,),
        in_specs=[
            pl.BlockSpec(memory_space=pltpu.MemorySpace.SMEM),     # afs (1,1)
            pl.BlockSpec((1, S, Hin), lambda b: (b, 0, 0)),        # x (permuted)
            const((Hin, 3 * H)),                                   # fused W
            const((1, H)),                                         # skip bias
            const((2, H)),                                         # lam
            const((2, H)),                                         # lam^C
            const((C, H)),                                         # Re(lam^k)
            const((C, H)),                                         # Im(lam^k)
            const((2, H)),                                         # h0
            const((H, H)), const((1, H)),                          # ff1
            const((H, H)), const((1, H)),                          # ff2
            const((1, H)), const((1, H)),                          # LN gamma/beta
        ],
        out_specs=pl.BlockSpec((1, S, H), lambda b: (b, 0, 0)),
        scratch_shapes=[
            pltpu.VMEM((S, 3 * H), jnp.float32),   # fused projection output
            pltpu.VMEM((S, H), jnp.float32),       # Re(local prefixes) -> Re(h)
            pltpu.VMEM((NC, H), jnp.float32),      # Re(chunk carries)
            pltpu.VMEM((NC, H), jnp.float32),      # Im(chunk carries)
            pltpu.VMEM((NC, H), jnp.float32),      # Re(G_prev)
            pltpu.VMEM((NC, H), jnp.float32),      # Im(G_prev)
        ],
        compiler_params=pltpu.CompilerParams(
            dimension_semantics=("parallel",),
            vmem_limit_bytes=32 * 1024 * 1024),
    )
    out = fsu(afs, xk, wf, bsk, lam_ri, lamc_ri, lamp_r, lamp_i, h0_ri,
              w1, b1, w2, b2, ln_g, ln_b)
    if C > 1 and NC > 1:
        out = out.reshape(B, C, NC, H).transpose(0, 2, 1, 3).reshape(B, S, H)
    return out


# ----------------------------------------------------------------------------
# Pure-JAX reference (serial recurrence) for validation
# ----------------------------------------------------------------------------
def fsu_reference(params, x):
    B, S, Hin = x.shape
    H = params["ln_g"].shape[0]
    lam_mod = jnp.exp(-jnp.exp(params["nu"]))
    lam_r = lam_mod * jnp.cos(params["theta"])
    lam_i = lam_mod * jnp.sin(params["theta"])
    delta = params["delta"]

    x2 = x.reshape(B * S, Hin)
    y = x2 @ params["skip"]["w"] + params["skip"]["b"]
    bxr = ((x2 @ params["B_real"]) * delta).reshape(B, S, H)
    bxi = ((x2 @ params["B_img"]) * delta).reshape(B, S, H)

    def step(carry, inp):
        hr, hi = carry
        br, bi = inp
        nr = lam_r * hr - lam_i * hi + br
        ni = lam_r * hi + lam_i * hr + bi
        return (nr, ni), nr

    h0r = jnp.broadcast_to(params["h0_real"][None, :], (B, H))
    h0i = jnp.broadcast_to(params["h0_img"][None, :], (B, H))
    _, r_seq = lax.scan(step, (h0r, h0i),
                        (bxr.transpose(1, 0, 2), bxi.transpose(1, 0, 2)))
    r = r_seq.transpose(1, 0, 2).reshape(B * S, H)

    f = jnp.maximum(r @ params["ff1"]["w"] + params["ff1"]["b"], 0.0)
    f = f @ params["ff2"]["w"] + params["ff2"]["b"]
    afs = jax.nn.sigmoid(params["alpha"])
    z = afs * f + (1.0 - afs) * y
    mean = z.mean(-1, keepdims=True)
    var = jnp.square(z - mean).mean(-1, keepdims=True)
    zn = (z - mean) * lax.rsqrt(var + 1e-6)
    return (zn * params["ln_g"] + params["ln_b"]).reshape(B, S, H)


# ----------------------------------------------------------------------------
# Deterministic parameter init (shapes per the PyTorch FSU/LRU __init__)
# ----------------------------------------------------------------------------
def _init_linear(key, fin, fout):
    kw, kb = jax.random.split(key)
    w = jax.random.normal(kw, (fin, fout), jnp.float32) / jnp.sqrt(float(fin))
    b = 0.01 * jax.random.normal(kb, (fout,), jnp.float32)
    return {"w": w, "b": b}


def init_fsu_params(key, hid):
    ks = jax.random.split(key, 9)
    u = jax.random.uniform(ks[0], (hid,), jnp.float32, minval=0.999, maxval=1.0)
    u = jnp.clip(u, 0.999, 0.999999)
    nu = jnp.log(-jnp.log(u))
    theta = jax.random.uniform(ks[1], (hid,), jnp.float32,
                               minval=0.0, maxval=math.pi / 10)
    delta = jnp.sqrt(1.0 - jnp.exp(-jnp.exp(nu)))
    return {
        "skip": _init_linear(ks[2], hid, hid),
        "ff1": _init_linear(ks[3], hid, hid),
        "ff2": _init_linear(ks[4], hid, hid),
        "B_real": jax.random.normal(ks[5], (hid, hid), jnp.float32),
        "B_img": jax.random.normal(ks[6], (hid, hid), jnp.float32),
        "h0_real": jax.random.normal(ks[7], (hid,), jnp.float32),
        "h0_img": jax.random.normal(ks[8], (hid,), jnp.float32),
        "nu": nu, "theta": theta, "delta": delta,
        "alpha": jnp.zeros((), jnp.float32),
        "ln_g": jnp.ones((hid,), jnp.float32),
        "ln_b": jnp.zeros((hid,), jnp.float32),
    }


# ----------------------------------------------------------------------------
if __name__ == "__main__":
    B, S, H = 2, 8, 32
    key = jax.random.PRNGKey(0)
    kx, kp = jax.random.split(key)
    x = jax.random.normal(kx, (B, S, H), dtype=jnp.float32)
    params = init_fsu_params(kp, H)

    # default (bf16 matmul inputs, f32 accumulation / recurrence)
    fwd_bf16 = jax.jit(functools.partial(fsu_forward, compute_dtype=jnp.bfloat16))
    out = fwd_bf16(params, x)
    jax.block_until_ready(out)
    assert out.shape == (B, S, H), out.shape
    assert bool(jnp.all(jnp.isfinite(out)))

    ref = jax.jit(fsu_reference)(params, x)

    # tight check against the f32 kernel path, loose check for the bf16 path
    out_f32 = jax.jit(functools.partial(fsu_forward, compute_dtype=jnp.float32))(params, x)
    err_f32 = float(jnp.max(jnp.abs(out_f32 - ref)))
    err_bf16 = float(jnp.max(jnp.abs(out.astype(jnp.float32) - ref)))
    assert err_f32 < 5e-3, f"f32 max abs err vs reference: {err_f32}"
    assert err_bf16 < 2e-1, f"bf16 max abs err vs reference: {err_bf16}"

    print("KERNEL_OK")
</pallas_src>

<mosaic_0001>
module attributes {stable_mosaic.version = 11 : i64} {
  func.func @_fsu_kernel(%arg0: i32, %arg1: memref<1x1xf32, #tpu.memory_space<smem>>, %arg2: memref<1x8x32xf32, #tpu.memory_space<vmem>>, %arg3: memref<32x96xbf16, #tpu.memory_space<vmem>>, %arg4: memref<1x32xf32, #tpu.memory_space<vmem>>, %arg5: memref<2x32xf32, #tpu.memory_space<vmem>>, %arg6: memref<2x32xf32, #tpu.memory_space<vmem>>, %arg7: memref<1x32xf32, #tpu.memory_space<vmem>>, %arg8: memref<1x32xf32, #tpu.memory_space<vmem>>, %arg9: memref<2x32xf32, #tpu.memory_space<vmem>>, %arg10: memref<32x32xbf16, #tpu.memory_space<vmem>>, %arg11: memref<1x32xf32, #tpu.memory_space<vmem>>, %arg12: memref<32x32xbf16, #tpu.memory_space<vmem>>, %arg13: memref<1x32xf32, #tpu.memory_space<vmem>>, %arg14: memref<1x32xf32, #tpu.memory_space<vmem>>, %arg15: memref<1x32xf32, #tpu.memory_space<vmem>>, %arg16: memref<1x8x32xf32, #tpu.memory_space<vmem>>, %arg17: memref<8x96xf32, #tpu.memory_space<vmem>>, %arg18: memref<8x32xf32, #tpu.memory_space<vmem>>, %arg19: memref<8x32xf32, #tpu.memory_space<vmem>>, %arg20: memref<8x32xf32, #tpu.memory_space<vmem>>, %arg21: memref<8x32xf32, #tpu.memory_space<vmem>>, %arg22: memref<8x32xf32, #tpu.memory_space<vmem>>) attributes {dimension_semantics = [#tpu.dimension_semantics<parallel>], iteration_bounds = array<i64: 2>, scalar_prefetch = 0 : i64, scratch_operands = 6 : i64, tpu.core_type = #tpu.core_type<tc>, window_params = [{transform_indices = @transform_0, window_bounds = array<i64: 1, 1>}, {transform_indices = @transform_1, window_bounds = array<i64: 1, 8, 32>}, {pipeline_mode = #tpu.pipeline_mode<synchronous>, transform_indices = @transform_2, window_bounds = array<i64: 32, 96>}, {pipeline_mode = #tpu.pipeline_mode<synchronous>, transform_indices = @transform_3, window_bounds = array<i64: 1, 32>}, {pipeline_mode = #tpu.pipeline_mode<synchronous>, transform_indices = @transform_4, window_bounds = array<i64: 2, 32>}, {pipeline_mode = #tpu.pipeline_mode<synchronous>, transform_indices = @transform_5, window_bounds = array<i64: 2, 32>}, {pipeline_mode = #tpu.pipeline_mode<synchronous>, transform_indices = @transform_6, window_bounds = array<i64: 1, 32>}, {pipeline_mode = #tpu.pipeline_mode<synchronous>, transform_indices = @transform_7, window_bounds = array<i64: 1, 32>}, {pipeline_mode = #tpu.pipeline_mode<synchronous>, transform_indices = @transform_8, window_bounds = array<i64: 2, 32>}, {pipeline_mode = #tpu.pipeline_mode<synchronous>, transform_indices = @transform_9, window_bounds = array<i64: 32, 32>}, {pipeline_mode = #tpu.pipeline_mode<synchronous>, transform_indices = @transform_10, window_bounds = array<i64: 1, 32>}, {pipeline_mode = #tpu.pipeline_mode<synchronous>, transform_indices = @transform_11, window_bounds = array<i64: 32, 32>}, {pipeline_mode = #tpu.pipeline_mode<synchronous>, transform_indices = @transform_12, window_bounds = array<i64: 1, 32>}, {pipeline_mode = #tpu.pipeline_mode<synchronous>, transform_indices = @transform_13, window_bounds = array<i64: 1, 32>}, {pipeline_mode = #tpu.pipeline_mode<synchronous>, transform_indices = @transform_14, window_bounds = array<i64: 1, 32>}, {transform_indices = @transform_15, window_bounds = array<i64: 1, 8, 32>}]} {
    %c0 = arith.constant 0 : index
    %c0_0 = arith.constant 0 : index
    %c0_1 = arith.constant 0 : index
    %0 = vector.load %arg2[%c0, %c0_0, %c0_1] : memref<1x8x32xf32, #tpu.memory_space<vmem>>, vector<1x8x32xf32>
    %1 = vector.shape_cast %0 : vector<1x8x32xf32> to vector<8x32xf32>
    %c0_2 = arith.constant 0 : index
    %c0_3 = arith.constant 0 : index
    %2 = vector.load %arg3[%c0_2, %c0_3] : memref<32x96xbf16, #tpu.memory_space<vmem>>, vector<32x96xbf16>
    %3 = arith.truncf %1 : vector<8x32xf32> to vector<8x32xbf16>
    %cst = arith.constant dense<0.000000e+00> : vector<8x96xf32>
    %4 = tpu.matmul %3, %2, %cst {dimension_numbers = #tpu.dot_dimension_numbers<[1], [0], [0], [1], [0, 0, 1, 1], [], []>} : vector<8x32xbf16>, vector<32x96xbf16>, vector<8x96xf32> -> vector<8x96xf32>
    %c0_4 = arith.constant 0 : index
    %c0_5 = arith.constant 0 : index
    %5 = vector.load %arg17[%c0_4, %c0_5] : memref<8x96xf32, #tpu.memory_space<vmem>>, vector<8x96xf32>
    tpu.vector_store %arg17[%c0_4, %c0_5], %4 {strides = array<i32>} : memref<8x96xf32, #tpu.memory_space<vmem>>, vector<8x96xf32>,
    %c0_6 = arith.constant 0 : index
    %c0_7 = arith.constant 0 : index
    %6 = vector.load %arg5[%c0_6, %c0_7] : memref<2x32xf32, #tpu.memory_space<vmem>>, vector<1x32xf32>
    %7 = vector.shape_cast %6 : vector<1x32xf32> to vector<1x32xf32>
    %8 = vector.broadcast %7 : vector<1x32xf32> to vector<8x32xf32>
    %c1 = arith.constant 1 : index
    %c0_8 = arith.constant 0 : index
    %9 = vector.load %arg5[%c1, %c0_8] : memref<2x32xf32, #tpu.memory_space<vmem>>, vector<1x32xf32>
    %10 = vector.shape_cast %9 : vector<1x32xf32> to vector<1x32xf32>
    %11 = vector.broadcast %10 : vector<1x32xf32> to vector<8x32xf32>
    %cst_9 = arith.constant 0.000000e+00 : f32
    %12 = vector.broadcast %cst_9 : f32 to vector<8x32xf32>
    %c0_i32 = arith.constant 0 : i32
    %c8_i32 = arith.constant 8 : i32
    %13 = arith.muli %c0_i32, %c8_i32 : i32
    %14 = tpu.assume_multiple %13, 8 : i32
    %15 = arith.index_cast %14 : i32 to index
    %c32 = arith.constant 32 : index
    %16 = vector.load %arg17[%15, %c32] : memref<8x96xf32, #tpu.memory_space<vmem>>, vector<8x32xf32>
    %17 = arith.index_cast %14 : i32 to index
    %c64 = arith.constant 64 : index
    %18 = vector.load %arg17[%17, %c64] : memref<8x96xf32, #tpu.memory_space<vmem>>, vector<8x32xf32>
    %19 = arith.mulf %8, %12 : vector<8x32xf32>
    %20 = arith.mulf %11, %12 : vector<8x32xf32>
    %21 = arith.subf %19, %20 : vector<8x32xf32>
    %22 = arith.addf %21, %16 : vector<8x32xf32>
    %23 = arith.mulf %8, %12 : vector<8x32xf32>
    %24 = arith.mulf %11, %12 : vector<8x32xf32>
    %25 = arith.addf %23, %24 : vector<8x32xf32>
    %26 = arith.addf %25, %18 : vector<8x32xf32>
    %27 = arith.index_cast %14 : i32 to index
    %c0_10 = arith.constant 0 : index
    %28 = vector.load %arg18[%27, %c0_10] : memref<8x32xf32, #tpu.memory_space<vmem>>, vector<8x32xf32>
    tpu.vector_store %arg18[%27, %c0_10], %22 {strides = array<i32>} : memref<8x32xf32, #tpu.memory_space<vmem>>, vector<8x32xf32>,
    %c1_i32 = arith.constant 1 : i32
    %c0_11 = arith.constant 0 : index
    %c0_12 = arith.constant 0 : index
    %29 = vector.load %arg19[%c0_11, %c0_12] : memref<8x32xf32, #tpu.memory_space<vmem>>, vector<8x32xf32>
    tpu.vector_store %arg19[%c0_11, %c0_12], %22 {strides = array<i32>} : memref<8x32xf32, #tpu.memory_space<vmem>>, vector<8x32xf32>,
    %c0_13 = arith.constant 0 : index
    %c0_14 = arith.constant 0 : index
    %30 = vector.load %arg20[%c0_13, %c0_14] : memref<8x32xf32, #tpu.memory_space<vmem>>, vector<8x32xf32>
    tpu.vector_store %arg20[%c0_13, %c0_14], %26 {strides = array<i32>} : memref<8x32xf32, #tpu.memory_space<vmem>>, vector<8x32xf32>,
    %c0_15 = arith.constant 0 : index
    %c0_16 = arith.constant 0 : index
    %31 = vector.load %arg6[%c0_15, %c0_16] : memref<2x32xf32, #tpu.memory_space<vmem>>, vector<1x32xf32>
    %c1_17 = arith.constant 1 : index
    %c0_18 = arith.constant 0 : index
    %32 = vector.load %arg6[%c1_17, %c0_18] : memref<2x32xf32, #tpu.memory_space<vmem>>, vector<1x32xf32>
    %c0_19 = arith.constant 0 : index
    %c0_20 = arith.constant 0 : index
    %33 = vector.load %arg9[%c0_19, %c0_20] : memref<2x32xf32, #tpu.memory_space<vmem>>, vector<1x32xf32>
    %c1_21 = arith.constant 1 : index
    %c0_22 = arith.constant 0 : index
    %34 = vector.load %arg9[%c1_21, %c0_22] : memref<2x32xf32, #tpu.memory_space<vmem>>, vector<1x32xf32>
    %c0_23 = arith.constant 0 : index
    %c0_24 = arith.constant 0 : index
    %35 = vector.load %arg21[%c0_23, %c0_24] : memref<8x32xf32, #tpu.memory_space<vmem>>, vector<1x32xf32>
    tpu.vector_store %arg21[%c0_23, %c0_24], %33 {strides = array<i32>} : memref<8x32xf32, #tpu.memory_space<vmem>>, vector<1x32xf32>,
    %c0_25 = arith.constant 0 : index
    %c0_26 = arith.constant 0 : index
    %36 = vector.load %arg22[%c0_25, %c0_26] : memref<8x32xf32, #tpu.memory_space<vmem>>, vector<1x32xf32>
    tpu.vector_store %arg22[%c0_25, %c0_26], %34 {strides = array<i32>} : memref<8x32xf32, #tpu.memory_space<vmem>>, vector<1x32xf32>,
    %c1_i32_27 = arith.constant 1 : i32
    %c7_i32 = arith.constant 7 : i32
    %37 = arith.addi %c1_i32_27, %c7_i32 : i32
    %c1_i32_28 = arith.constant 1 : i32
    %38:2 = scf.for %arg23 = %c1_i32_27 to %37 step %c1_i32_28 iter_args(%arg24 = %33, %arg25 = %34) -> (vector<1x32xf32>, vector<1x32xf32>)  : i32 {
      %c1_i32_73 = arith.constant 1 : i32
      %110 = arith.subi %arg23, %c1_i32_73 : i32
      %111 = arith.index_cast %110 : i32 to index
      %c0_74 = arith.constant 0 : index
      %112 = vector.load %arg19[%111, %c0_74] : memref<8x32xf32, #tpu.memory_space<vmem>>, vector<1x32xf32>
      %c1_i32_75 = arith.constant 1 : i32
      %113 = arith.subi %arg23, %c1_i32_75 : i32
      %114 = arith.index_cast %113 : i32 to index
      %c0_76 = arith.constant 0 : index
      %115 = vector.load %arg20[%114, %c0_76] : memref<8x32xf32, #tpu.memory_space<vmem>>, vector<1x32xf32>
      %116 = arith.mulf %31, %arg24 : vector<1x32xf32>
      %117 = arith.mulf %32, %arg25 : vector<1x32xf32>
      %118 = arith.subf %116, %117 : vector<1x32xf32>
      %119 = arith.addf %118, %112 : vector<1x32xf32>
      %120 = arith.mulf %31, %arg25 : vector<1x32xf32>
      %121 = arith.mulf %32, %arg24 : vector<1x32xf32>
      %122 = arith.addf %120, %121 : vector<1x32xf32>
      %123 = arith.addf %122, %115 : vector<1x32xf32>
      %124 = arith.index_cast %arg23 : i32 to index
      %c0_77 = arith.constant 0 : index
      %125 = vector.load %arg21[%124, %c0_77] : memref<8x32xf32, #tpu.memory_space<vmem>>, vector<1x32xf32>
      tpu.vector_store %arg21[%124, %c0_77], %119 {strides = array<i32>} : memref<8x32xf32, #tpu.memory_space<vmem>>, vector<1x32xf32>,
      %126 = arith.index_cast %arg23 : i32 to index
      %c0_78 = arith.constant 0 : index
      %127 = vector.load %arg22[%126, %c0_78] : memref<8x32xf32, #tpu.memory_space<vmem>>, vector<1x32xf32>
      tpu.vector_store %arg22[%126, %c0_78], %123 {strides = array<i32>} : memref<8x32xf32, #tpu.memory_space<vmem>>, vector<1x32xf32>,
      scf.yield %119, %123 : vector<1x32xf32>, vector<1x32xf32>
    }
    %c7_i32_29 = arith.constant 7 : i32
    %c0_30 = arith.constant 0 : index
    %c0_31 = arith.constant 0 : index
    %39 = vector.load %arg21[%c0_30, %c0_31] : memref<8x32xf32, #tpu.memory_space<vmem>>, vector<8x32xf32>
    %c0_32 = arith.constant 0 : index
    %c0_33 = arith.constant 0 : index
    %40 = vector.load %arg22[%c0_32, %c0_33] : memref<8x32xf32, #tpu.memory_space<vmem>>, vector<8x32xf32>
    %c0_i32_34 = arith.constant 0 : i32
    %c8_i32_35 = arith.constant 8 : i32
    %41 = arith.muli %c0_i32_34, %c8_i32_35 : i32
    %42 = tpu.assume_multiple %41, 8 : i32
    %43 = arith.index_cast %c0_i32_34 : i32 to index
    %c0_36 = arith.constant 0 : index
    %44 = vector.load %arg7[%43, %c0_36] : memref<1x32xf32, #tpu.memory_space<vmem>>, vector<1x32xf32>
    %45 = arith.index_cast %c0_i32_34 : i32 to index
    %c0_37 = arith.constant 0 : index
    %46 = vector.load %arg8[%45, %c0_37] : memref<1x32xf32, #tpu.memory_space<vmem>>, vector<1x32xf32>
    %47 = arith.index_cast %42 : i32 to index
    %c0_38 = arith.constant 0 : index
    %48 = vector.load %arg18[%47, %c0_38] : memref<8x32xf32, #tpu.memory_space<vmem>>, vector<8x32xf32>
    %49 = vector.broadcast %44 : vector<1x32xf32> to vector<8x32xf32>
    %50 = arith.mulf %49, %39 : vector<8x32xf32>
    %51 = arith.addf %48, %50 : vector<8x32xf32>
    %52 = vector.broadcast %46 : vector<1x32xf32> to vector<8x32xf32>
    %53 = arith.mulf %52, %40 : vector<8x32xf32>
    %54 = arith.subf %51, %53 : vector<8x32xf32>
    %55 = arith.index_cast %42 : i32 to index
    %c0_39 = arith.constant 0 : index
    %56 = vector.load %arg18[%55, %c0_39] : memref<8x32xf32, #tpu.memory_space<vmem>>, vector<8x32xf32>
    tpu.vector_store %arg18[%55, %c0_39], %54 {strides = array<i32>} : memref<8x32xf32, #tpu.memory_space<vmem>>, vector<8x32xf32>,
    %c1_i32_40 = arith.constant 1 : i32
    %c0_41 = arith.constant 0 : index
    %c0_42 = arith.constant 0 : index
    %57 = vector.load %arg18[%c0_41, %c0_42] : memref<8x32xf32, #tpu.memory_space<vmem>>, vector<8x32xf32>
    %c0_43 = arith.constant 0 : index
    %c0_44 = arith.constant 0 : index
    %58 = vector.load %arg10[%c0_43, %c0_44] : memref<32x32xbf16, #tpu.memory_space<vmem>>, vector<32x32xbf16>
    %59 = arith.truncf %57 : vector<8x32xf32> to vector<8x32xbf16>
    %cst_45 = arith.constant dense<0.000000e+00> : vector<8x32xf32>
    %60 = tpu.matmul %59, %58, %cst_45 {dimension_numbers = #tpu.dot_dimension_numbers<[1], [0], [0], [1], [0, 0, 1, 1], [], []>} : vector<8x32xbf16>, vector<32x32xbf16>, vector<8x32xf32> -> vector<8x32xf32>
    %c0_46 = arith.constant 0 : index
    %c0_47 = arith.constant 0 : index
    %61 = vector.load %arg11[%c0_46, %c0_47] : memref<1x32xf32, #tpu.memory_space<vmem>>, vector<1x32xf32>
    %62 = vector.broadcast %61 : vector<1x32xf32> to vector<8x32xf32>
    %63 = arith.addf %60, %62 : vector<8x32xf32>
    %cst_48 = arith.constant 0.000000e+00 : f32
    %64 = vector.broadcast %cst_48 : f32 to vector<8x32xf32>
    %65 = arith.maximumf %63, %64 : vector<8x32xf32>
    %c0_49 = arith.constant 0 : index
    %c0_50 = arith.constant 0 : index
    %66 = vector.load %arg12[%c0_49, %c0_50] : memref<32x32xbf16, #tpu.memory_space<vmem>>, vector<32x32xbf16>
    %67 = arith.truncf %65 : vector<8x32xf32> to vector<8x32xbf16>
    %cst_51 = arith.constant dense<0.000000e+00> : vector<8x32xf32>
    %68 = tpu.matmul %67, %66, %cst_51 {dimension_numbers = #tpu.dot_dimension_numbers<[1], [0], [0], [1], [0, 0, 1, 1], [], []>} : vector<8x32xbf16>, vector<32x32xbf16>, vector<8x32xf32> -> vector<8x32xf32>
    %c0_52 = arith.constant 0 : index
    %c0_53 = arith.constant 0 : index
    %69 = vector.load %arg13[%c0_52, %c0_53] : memref<1x32xf32, #tpu.memory_space<vmem>>, vector<1x32xf32>
    %70 = vector.broadcast %69 : vector<1x32xf32> to vector<8x32xf32>
    %71 = arith.addf %68, %70 : vector<8x32xf32>
    %c0_54 = arith.constant 0 : index
    %c0_55 = arith.constant 0 : index
    %72 = memref.load %arg1[%c0_54, %c0_55] : memref<1x1xf32, #tpu.memory_space<smem>>
    %c0_56 = arith.constant 0 : index
    %c0_57 = arith.constant 0 : index
    %73 = vector.load %arg17[%c0_56, %c0_57] : memref<8x96xf32, #tpu.memory_space<vmem>>, vector<8x32xf32>
    %c0_58 = arith.constant 0 : index
    %c0_59 = arith.constant 0 : index
    %74 = vector.load %arg4[%c0_58, %c0_59] : memref<1x32xf32, #tpu.memory_space<vmem>>, vector<1x32xf32>
    %75 = vector.broadcast %74 : vector<1x32xf32> to vector<8x32xf32>
    %76 = arith.addf %73, %75 : vector<8x32xf32>
    %77 = vector.broadcast %72 : f32 to vector<8x32xf32>
    %78 = arith.mulf %77, %71 : vector<8x32xf32>
    %cst_60 = arith.constant 1.000000e+00 : f32
    %79 = arith.subf %cst_60, %72 : f32
    %80 = vector.broadcast %79 : f32 to vector<8x32xf32>
    %81 = arith.mulf %80, %76 : vector<8x32xf32>
    %82 = arith.addf %78, %81 : vector<8x32xf32>
    %cst_61 = arith.constant dense<0.000000e+00> : vector<8xf32>
    %83 = vector.multi_reduction <add>, %82, %cst_61 [1] : vector<8x32xf32> to vector<8xf32>
    %84 = vector.shape_cast %83 : vector<8xf32> to vector<8x1xf32>
    %cst_62 = arith.constant 3.200000e+01 : f32
    %85 = vector.broadcast %cst_62 : f32 to vector<8x1xf32>
    %86 = arith.divf %84, %85 : vector<8x1xf32>
    %87 = vector.broadcast %86 : vector<8x1xf32> to vector<8x32xf32>
    %88 = arith.subf %82, %87 : vector<8x32xf32>
    %89 = arith.mulf %88, %88 : vector<8x32xf32>
    %cst_63 = arith.constant dense<0.000000e+00> : vector<8xf32>
    %90 = vector.multi_reduction <add>, %89, %cst_63 [1] : vector<8x32xf32> to vector<8xf32>
    %91 = vector.shape_cast %90 : vector<8xf32> to vector<8x1xf32>
    %cst_64 = arith.constant 3.200000e+01 : f32
    %92 = vector.broadcast %cst_64 : f32 to vector<8x1xf32>
    %93 = arith.divf %91, %92 : vector<8x1xf32>
    %94 = vector.broadcast %86 : vector<8x1xf32> to vector<8x32xf32>
    %95 = arith.subf %82, %94 : vector<8x32xf32>
    %cst_65 = arith.constant 9.99999997E-7 : f32
    %96 = vector.broadcast %cst_65 : f32 to vector<8x1xf32>
    %97 = arith.addf %93, %96 : vector<8x1xf32>
    %98 = math.rsqrt %97 : vector<8x1xf32>
    %99 = vector.broadcast %98 : vector<8x1xf32> to vector<8x32xf32>
    %100 = arith.mulf %95, %99 : vector<8x32xf32>
    %c0_66 = arith.constant 0 : index
    %c0_67 = arith.constant 0 : index
    %101 = vector.load %arg14[%c0_66, %c0_67] : memref<1x32xf32, #tpu.memory_space<vmem>>, vector<1x32xf32>
    %102 = vector.broadcast %101 : vector<1x32xf32> to vector<8x32xf32>
    %103 = arith.mulf %100, %102 : vector<8x32xf32>
    %c0_68 = arith.constant 0 : index
    %c0_69 = arith.constant 0 : index
    %104 = vector.load %arg15[%c0_68, %c0_69] : memref<1x32xf32, #tpu.memory_space<vmem>>, vector<1x32xf32>
    %105 = vector.broadcast %104 : vector<1x32xf32> to vector<8x32xf32>
    %106 = arith.addf %103, %105 : vector<8x32xf32>
    %c0_70 = arith.constant 0 : index
    %c0_71 = arith.constant 0 : index
    %c0_72 = arith.constant 0 : index
    %107 = vector.load %arg16[%c0_70, %c0_71, %c0_72] : memref<1x8x32xf32, #tpu.memory_space<vmem>>, vector<1x8x32xf32>
    %108 = vector.shape_cast %107 : vector<1x8x32xf32> to vector<8x32xf32>
    %109 = vector.shape_cast %106 : vector<8x32xf32> to vector<1x8x32xf32>
    tpu.vector_store %arg16[%c0_70, %c0_71, %c0_72], %109 {strides = array<i32>} : memref<1x8x32xf32, #tpu.memory_space<vmem>>, vector<1x8x32xf32>,
    return
  }
  func.func @transform_0(%arg0: i32) -> (i32, i32) {
    %c0_i32 = arith.constant 0 : i32
    %c0_i32_0 = arith.constant 0 : i32
    %c0_i32_1 = arith.constant 0 : i32
    return %c0_i32, %c0_i32_0 : i32, i32
  }
  func.func @transform_1(%arg0: i32) -> (i32, i32, i32) {
    %c0_i32 = arith.constant 0 : i32
    %c0_i32_0 = arith.constant 0 : i32
    %c0_i32_1 = arith.constant 0 : i32
    return %arg0, %c0_i32, %c0_i32_0 : i32, i32, i32
  }
  func.func @transform_2(%arg0: i32) -> (i32, i32) {
    %c0_i32 = arith.constant 0 : i32
    %c0_i32_0 = arith.constant 0 : i32
    %c0_i32_1 = arith.constant 0 : i32
    return %c0_i32, %c0_i32_0 : i32, i32
  }
  func.func @transform_3(%arg0: i32) -> (i32, i32) {
    %c0_i32 = arith.constant 0 : i32
    %c0_i32_0 = arith.constant 0 : i32
    %c0_i32_1 = arith.constant 0 : i32
    return %c0_i32, %c0_i32_0 : i32, i32
  }
  func.func @transform_4(%arg0: i32) -> (i32, i32) {
    %c0_i32 = arith.constant 0 : i32
    %c0_i32_0 = arith.constant 0 : i32
    %c0_i32_1 = arith.constant 0 : i32
    return %c0_i32, %c0_i32_0 : i32, i32
  }
  func.func @transform_5(%arg0: i32) -> (i32, i32) {
    %c0_i32 = arith.constant 0 : i32
    %c0_i32_0 = arith.constant 0 : i32
    %c0_i32_1 = arith.constant 0 : i32
    return %c0_i32, %c0_i32_0 : i32, i32
  }
  func.func @transform_6(%arg0: i32) -> (i32, i32) {
    %c0_i32 = arith.constant 0 : i32
    %c0_i32_0 = arith.constant 0 : i32
    %c0_i32_1 = arith.constant 0 : i32
    return %c0_i32, %c0_i32_0 : i32, i32
  }
  func.func @transform_7(%arg0: i32) -> (i32, i32) {
    %c0_i32 = arith.constant 0 : i32
    %c0_i32_0 = arith.constant 0 : i32
    %c0_i32_1 = arith.constant 0 : i32
    return %c0_i32, %c0_i32_0 : i32, i32
  }
  func.func @transform_8(%arg0: i32) -> (i32, i32) {
    %c0_i32 = arith.constant 0 : i32
    %c0_i32_0 = arith.constant 0 : i32
    %c0_i32_1 = arith.constant 0 : i32
    return %c0_i32, %c0_i32_0 : i32, i32
  }
  func.func @transform_9(%arg0: i32) -> (i32, i32) {
    %c0_i32 = arith.constant 0 : i32
    %c0_i32_0 = arith.constant 0 : i32
    %c0_i32_1 = arith.constant 0 : i32
    return %c0_i32, %c0_i32_0 : i32, i32
  }
  func.func @transform_10(%arg0: i32) -> (i32, i32) {
    %c0_i32 = arith.constant 0 : i32
    %c0_i32_0 = arith.constant 0 : i32
    %c0_i32_1 = arith.constant 0 : i32
    return %c0_i32, %c0_i32_0 : i32, i32
  }
  func.func @transform_11(%arg0: i32) -> (i32, i32) {
    %c0_i32 = arith.constant 0 : i32
    %c0_i32_0 = arith.constant 0 : i32
    %c0_i32_1 = arith.constant 0 : i32
    return %c0_i32, %c0_i32_0 : i32, i32
  }
  func.func @transform_12(%arg0: i32) -> (i32, i32) {
    %c0_i32 = arith.constant 0 : i32
    %c0_i32_0 = arith.constant 0 : i32
    %c0_i32_1 = arith.constant 0 : i32
    return %c0_i32, %c0_i32_0 : i32, i32
  }
  func.func @transform_13(%arg0: i32) -> (i32, i32) {
    %c0_i32 = arith.constant 0 : i32
    %c0_i32_0 = arith.constant 0 : i32
    %c0_i32_1 = arith.constant 0 : i32
    return %c0_i32, %c0_i32_0 : i32, i32
  }
  func.func @transform_14(%arg0: i32) -> (i32, i32) {
    %c0_i32 = arith.constant 0 : i32
    %c0_i32_0 = arith.constant 0 : i32
    %c0_i32_1 = arith.constant 0 : i32
    return %c0_i32, %c0_i32_0 : i32, i32
  }
  func.func @transform_15(%arg0: i32) -> (i32, i32, i32) {
    %c0_i32 = arith.constant 0 : i32
    %c0_i32_0 = arith.constant 0 : i32
    %c0_i32_1 = arith.constant 0 : i32
    return %arg0, %c0_i32, %c0_i32_0 : i32, i32, i32
  }
}

</mosaic_0001>

<bundles_post_ra>
// kernel: fsu_forward.1
= control target key start
LH: loop header
LB: loop body
LE: loop exit
PB: predicated region body
PF: predicated region fallthrough
CT: control target
= control target key end

     0   :  { %s1408_s0 = inlined_call_operand.<no memory space> [shape: f32[1,1], index: 0, kind: input, shape index: {}]   ;;  %s1409_s1 = inlined_call_operand.vmem [shape: f32[2,8,32], index: 1, kind: input, shape index: {}]   ;;  %s1410_s2 = inlined_call_operand.vmem [shape: bf16[32,96], index: 2, kind: input, shape index: {}]   ;;  %s1411_s3 = inlined_call_operand.vmem [shape: f32[1,32], index: 3, kind: input, shape index: {}]   ;;  %s1412_s4 = inlined_call_operand.vmem [shape: f32[2,32], index: 4, kind: input, shape index: {}]   ;;  %s1413_s5 = inlined_call_operand.vmem [shape: f32[2,32], index: 5, kind: input, shape index: {}]   ;;  %s1414_s6 = inlined_call_operand.vmem [shape: f32[1,32], index: 6, kind: input, shape index: {}]   ;;  %s1415_s7 = inlined_call_operand.vmem [shape: f32[1,32], index: 7, kind: input, shape index: {}]   ;;  %s1416_s8 = inlined_call_operand.vmem [shape: f32[2,32], index: 8, kind: input, shape index: {}]   ;;  %s1417_s9 = inlined_call_operand.vmem [shape: bf16[32,32], index: 9, kind: input, shape index: {}]   ;;  %s1418_s10 = inlined_call_operand.vmem [shape: f32[1,32], index: 10, kind: input, shape index: {}]   ;;  %s1419_s11 = inlined_call_operand.vmem [shape: bf16[32,32], index: 11, kind: input, shape index: {}]   ;;  %s1420_s12 = inlined_call_operand.vmem [shape: f32[1,32], index: 12, kind: input, shape index: {}]   ;;  %s1421_s13 = inlined_call_operand.vmem [shape: f32[1,32], index: 13, kind: input, shape index: {}]   ;;  %s1422_s14 = inlined_call_operand.vmem [shape: f32[1,32], index: 14, kind: input, shape index: {}]   ;;  %s1423_s15 = inlined_call_operand.hbm [shape: f32[2,8,32], index: 15, kind: output, shape index: {}]  }
   0x1   :  { %1426 = sst [smem:[#allocation14_spill]] %s1409_s1 }
   0x2   :  { %1427 = sst [smem:[#allocation15_spill]] %s1410_s2 }
   0x3   :  { %1428 = sst [smem:[#allocation16_spill]] %s1411_s3 }
   0x4   :  { %20 = sst [smem:[#allocation8]] %s1408_s0 }
   0x5   :  { %21 = vsyncpa [#allocation10], 0 }
   0x6   :  { %23 = vsyncpa [#allocation10 + $0x1], 0  ;;  %s1227_s20 = smov 0   ;;  %s1229_s21 = smov 0  }
   0x7   :  { %s1231_s22 = smov 0   ;;  %s1233_s23 = smov 0  }
   0x8 LB: > { %1429 = sst [smem:[#allocation12_spill]] %s1121_s22  ;;  %s1248_s0 = sadd.s32 4294967295, %s1125_s23   ;;  %s1125_s23 = sphi %s1233_s23, %s1441_s23   ;;  %s1121_s22 = sphi %s1231_s22, %s1438_s22   ;;  %s1117_s21 = sphi %s1229_s21, %s1440_s21   ;;  %s1113_s20 = sphi %s1227_s20, %s1439_s20  }
   0x9   : > { %s908_s24 = sadd.s32 4294967294, %s1125_s23   ;;  %s1252_s25 = sadd.s32 1, %s1125_s23  }
   0xa   : > { %s356_s26 = sadd.s32 1, %s1121_s22  ;;  %s353_s27 = ssub.s32 %s1125_s23, %s1252_s25 }
   0xb   : > { %p366_p0 = scmp.ne.s32.totalorder %s1121_s22, %s1117_s21  ;;  %p354_p1 = scmp.eq.s32.totalorder %s353_s27, 0 }
   0xc   : > { %p367_p2 = scmp.eq.s32.totalorder %s1248_s0, 1  ;;  %p372_p3 = scmp.ne.s32.totalorder %s1117_s21, %s1113_s20 }
   0xd   : > { %p373_p4 = scmp.eq.s32.totalorder %s908_s24, 1  ;;  %p911_p7 = scmp.ge.s32.totalorder %s1125_s23, 1 }
   0xe   : > { %s1263_s28 = scalar_select %p354_p1, %s1121_s22, %s356_s26  }
   0xf   : > { %p1265_p5 = por %p367_p2, %p366_p0  ;;  %p1269_p6 = por %p373_p4, %p372_p3 }
  0x10   : > { %1430 = sst [smem:[#allocation13_spill]] %s1263_s28  ;;  %p440_p8 = scmp.lt.s32.totalorder %s1125_s23, 3 }
  0x12   : > { %p441_p9 = pnand %p911_p7, %p440_p8 }
  0x13   : > { %s1424_s16 = sand.u32 (!%p441_p9), 1, %s1117_s21   ;;  %s1433_s2 = sld [smem:[#allocation15_spill]] (!%p441_p9) }
  0x14   : > { %444 = sbr.rel (%p441_p9) target bundleno = 1107 (0x453), region = 80  ;;  %s1278_s17 = sshll.u32 (!%p441_p9), %s1424_s16, 3 }
  0x15   : > { %p487_p10 = scmp.lt.s32.totalorder (!%p441_p9), %s1248_s0, 1  ;;  %s1434_s1 = sld [smem:[#allocation14_spill]] (!%p441_p9) }
  0x16   : > { %s486_s28 = scalar_lea.vmem (!%p441_p9), [#allocation9], %s1278_s17 }
  0x19   : > { %v1139_v0 = vmov 0.0   ;;  %v1045_v1 = vld [vmem:[%s1433_s2 + $0x8] sm:$0xff]   ;;  %v1046_v2 = vld [vmem:[%s1433_s2] sm:$0xff]   ;;  %vm1140_vm0 = vmmov 0   ;;  %s488_s27 = scalar_select %p487_p10, %s1248_s0, 1  ;;  %vm510_vm1 = vcmask 261120  }
  0x1a   : > { %954 = vmatprep.subr.bf16.mxu0 %v1139_v0  ;;  %958 = vmatprep.mubr.msk.bf16.mxu0 %vm1140_vm0, %v1139_v0  ;;  %vm554_vm2 = vcmask 785408   ;;  %v585_v6 = vld [vmem:[%s1416_s8] sm:$0x1]   ;;  %v586_v7 = vld [vmem:[%s1416_s8 + $0x1] sm:$0x1]   ;;  %vm587_vm3 = vcmask 253952  }
  0x1b   : > { %955 = vmatpush3.bf16.msra.mxu0 %v1045_v1  ;;  %s913_s16 = sshll.u32 %s488_s27, 3  ;;  %v583_v9 = vld [vmem:[%s1413_s5] sm:$0x1]  ;;  %v584_v10 = vld [vmem:[%s1413_s5 + $0x1] sm:$0x1]  ;;  %s1142_s2 = smov 64   ;;  %v1127_v24 = vmov %v586_v7   ;;  %v1131_v25 = vmov %v585_v6  }
  0x1c   : > { %956 = vmatprep.subr.bf16.mxu0 %v1139_v0  ;;  %s490_s18 = scalar_lea.vmem %s1434_s1, %s913_s16  ;;  %588 = vst.msk [vmem:[#allocation6] sm:$0x1] %vm587_vm3, %v585_v6  ;;  %589 = vst.msk [vmem:[#allocation7] sm:$0x1] %vm587_vm3, %v586_v7  ;;  %v917_v14 = vld [vmem:[%s1412_s4] ss:$0 sm:$0xff] }
  0x1d   : > { %v492_v3 = vld [vmem:[%s490_s18] sm:$0xff]  ;;  %s1141_s18 = smov 96   ;;  %v567_v16 = vmul.f32 0.0, %v917_v14  ;;  %s1135_s16 = smov 1  }
  0x1e   : > { %v497_v4 = vpack.c.bf16 %v492_v3, %v492_v3  ;;  %v918_v15 = vld [vmem:[%s1412_s4 + $0x1] ss:$0 sm:$0xff] }
  0x1f   : > { %957 = vmatpush3.bf16.msra.mxu0 %v1046_v2  ;;  %v568_v17 = vmul.f32 0.0, %v918_v15 }
  0x21   : > { %v569_v18 = vsub.f32 %v567_v16, %v568_v17  ;;  %v575_v21 = vadd.f32 %v568_v17, %v567_v16 }
  0x22   : > { %959 = vmatmul.mubr.msk.bf16.vlgmr.msra.gmra.mxu0 %vm510_vm1, %v497_v4 }
  0xe2   : > { %v548_v5 = vpop.f32.mrf.mxu0 }
  0xe3   : > { %555 = vst.msk [vmem:[#allocation2] sm:$0xff] %vm554_vm2, %v548_v5 }
  0xe4   : > { %v960_v8 = vpop.f32.mrf.mxu0 }
  0xe6   : > { %v551_v11 = vpop.f32.mrf.mxu0 }
  0xe8   : > { %v961_v12 = vpop.f32.mrf.mxu0 }
  0xea   : > { %v566_v13 = vld [vmem:[#allocation2] sm:$0xff] }
  0xeb   : > { %571 = vrot.lane.b32.xlu0 %v566_v13, %s1141_s18 }
  0xef   : > { %576 = vrot.lane.b32.xlu0 %v566_v13, %s1142_s2 }
 0x15d   : > { %v572_v19 = vpop.permute.xlu0 %571 }
 0x15e   : > { %v574_v20 = vadd.f32 %v572_v19, %v569_v18 }
 0x160   : > { %580 = vst.msk [vmem:[#allocation3] sm:$0xff] %vm510_vm1, %v574_v20  ;;  %581 = vst.msk [vmem:[#allocation4] sm:$0xff] %vm510_vm1, %v574_v20 }
 0x161   : > { %v577_v22 = vpop.permute.xlu0 %576 }
 0x162   : > { %v579_v23 = vadd.f32 %v577_v22, %v575_v21 }
 0x164   : > { %582 = vst.msk [vmem:[#allocation5] sm:$0xff] %vm510_vm1, %v579_v23 }
 0x165 LB: >> { %v603_v26 = vmul.f32 %v1133_v25, %v583_v9  ;;  %v604_v27 = vmul.f32 %v1129_v24, %v584_v10  ;;  %v607_v28 = vmul.f32 %v1129_v24, %v583_v9  ;;  %v608_v29 = vmul.f32 %v1133_v25, %v584_v10  ;;  %s939_s27 = scalar_lea.vmem [#allocation4], %s1137_s16  ;;  %s942_s18 = scalar_lea.vmem [#allocation5], %s1137_s16  ;;  %s1137_s16 = sphi %s1135_s16, %s595_s16   ;;  %v1133_v25 = vphi %v1131_v25, %v606_v25   ;;  %v1129_v24 = vphi %v1127_v24, %v610_v24  }
 0x166   : >> { %s611_s2 = scalar_lea.vmem [#allocation6], %s1137_s16  ;;  %s613_s19 = scalar_lea.vmem [#allocation7], %s1137_s16 }
 0x167   : >> { %v941_v30 = vld [vmem:[%s939_s27 - $0x1] sm:$0x1]  ;;  %v605_v31 = vsub.f32 %v603_v26, %v604_v27  ;;  %v609_v33 = vadd.f32 %v608_v29, %v607_v28  ;;  %s595_s16 = sadd.s32 1, %s1137_s16  }
 0x168   : >> { %p592_p11 = scmp.ge.s32.totalorder %s595_s16, 8  }
 0x169   : >> { %v606_v25 = vadd.f32 %v941_v30, %v605_v31   ;;  %962 = vmatprep.subr.bf16.mxu1 (%p592_p11), %v1139_v0  ;;  %v1047_v34 = vld [vmem:[%s1417_s9 + $0x8] sm:$0xff] (%p592_p11)   ;;  %966 = vmatprep.mubr.msk.bf16.mxu1 (%p592_p11), %vm1140_vm0, %v1139_v0  ;;  %v1048_v35 = vld [vmem:[%s1417_s9] sm:$0xff] (%p592_p11)   ;;  %s1435_s3 = sld [smem:[#allocation16_spill]] (%p592_p11)  ;;  %s936_s24 = sshll.u32 (%p592_p11), %s1248_s0, 7 }
 0x16a   : > { %594 = sbr.rel (!%p592_p11) target bundleno = 357 (0x165), region = 126  ;;  %970 = vmatprep.subr.bf16.mxu0 (%p592_p11), %v1139_v0  ;;  %974 = vmatprep.mubr.msk.bf16.mxu0 (%p592_p11), %vm1140_vm0, %v1139_v0  ;;  %v922_v38 = vld [vmem:[%s1414_s6] ss:$0 sm:$0xff] (%p592_p11)  ;;  %v619_v40 = vld [vmem:[#allocation3] sm:$0xff] (%p592_p11)  ;;  %s832_s1 = scalar_lea.hbm (%p592_p11), %s1423_s15, %s936_s24 }
 0x16b   : >> { %v944_v32 = vld [vmem:[%s942_s18 - $0x1] sm:$0x1]  ;;  %612 = vst.msk [vmem:[%s611_s2] sm:$0x1] %vm587_vm3, %v606_v25  ;;  %963 = vmatpush3.bf16.msra.mxu1 (%p592_p11), %v1047_v34  ;;  %v923_v39 = vld [vmem:[%s1415_s7] ss:$0 sm:$0xff] (%p592_p11) }
 0x16c   : >> { %v610_v24 = vadd.f32 %v944_v32, %v609_v33   ;;  %964 = vmatprep.subr.bf16.mxu1 (%p592_p11), %v1139_v0  ;;  %v1049_v47 = vld [vmem:[%s1419_s11 + $0x8] sm:$0xff] (%p592_p11)   ;;  %v1050_v48 = vld [vmem:[%s1419_s11] sm:$0xff] (%p592_p11)   ;;  %s773_s2 = sld [smem:[#allocation8]] (%p592_p11)  ;;  %s1436_s16 = sand.u32 (%p592_p11), 1, %s1117_s21  }
 0x16d   : > { %971 = vmatpush3.bf16.msra.mxu0 (%p592_p11), %v1049_v47  ;;  %v924_v49 = vld [vmem:[%s1418_s10] ss:$0 sm:$0xff] (%p592_p11)  ;;  %s821_s18 = scalar_lea.sflag (%p592_p11), [#allocation10], %s1436_s16  ;;  %s1143_s0 = smov (%p592_p11), [#allocation9]  }
 0x16e   : >> { %614 = vst.msk [vmem:[%s613_s19] sm:$0x1] %vm587_vm3, %v610_v24  ;;  %972 = vmatprep.subr.bf16.mxu0 (%p592_p11), %v1139_v0  ;;  %v774_v57 = vld [vmem:[#allocation2] sm:$0xff] (%p592_p11) }
 0x16f   : > { %965 = vmatpush3.bf16.msra.mxu1 %v1048_v35  ;;  %v932_v58 = vld [vmem:[%s1435_s3] ss:$0 sm:$0xff] }
 0x170   : > { %v782_v59 = vadd.f32 %v932_v58, %v774_v57  ;;  %v928_v60 = vld [vmem:[%s1420_s12] ss:$0 sm:$0xff] }
 0x171   : > { %973 = vmatpush3.bf16.msra.mxu0 %v1050_v48  ;;  %v933_v17 = vld [vmem:[%s1421_s13] ss:$0 sm:$0xff] }
 0x172   : > { %v615_v36 = vld [vmem:[#allocation6] sm:$0xff]  ;;  %s785_s26 = ssub.f32 1.0, %s773_s2  ;;  %v783_v63 = vstv %s773_s2  ;;  %s1057_s2 = sshll.u32 %s1143_s0, 4  ;;  %s1058_s2 = int_to_ptr.vmem [resolvable:$false] %s1057_s2 }
 0x173   : > { %v626_v41 = vmul.f32 %v922_v38, %v615_v36  ;;  %v934_v19 = vld [vmem:[%s1422_s14] ss:$0 sm:$0xff]  ;;  %s1059_s19 = scalar_lea.vmem %s1058_s2, 256 }
 0x174   : > { %v786_v61 = vstv %s785_s26  ;;  %s834_s26 = sshll.u32 %s486_s28, 4  ;;  %s835_s26 = int_to_ptr.vmem [resolvable:$true] %s834_s26 }
 0x175   : > { %v616_v37 = vld [vmem:[#allocation7] sm:$0xff]  ;;  %v627_v43 = vadd.f32 %v626_v41, %v619_v40  ;;  %v787_v1 = vmul.f32 %v786_v61, %v782_v59  ;;  %s1053_s3 = scalar_lea.vmem %s835_s26, 128  ;;  %p1060_p1 = scmp.lt.s32.totalorder %s835_s26, %s1058_s2 }
 0x176   : > { %v634_v42 = vmul.f32 %v923_v39, %v616_v37  ;;  %p1054_p12 = scmp.ne.s32.totalorder %s835_s26, %s1053_s3  ;;  %p1061_p2 = scmp.lt.s32.totalorder %s1059_s19, %s1053_s3 }
 0x178   : > { %v635_v44 = vsub.f32 %v627_v43, %v634_v42  ;;  %p1055_p13 = pnand %p1054_p12, %p1265_p5  ;;  %p1062_p3 = por %p1061_p2, %p1060_p1 }
 0x17a   : > { %636 = vst.msk [vmem:[#allocation3] sm:$0xff] %vm510_vm1, %v635_v44  ;;  %p1056_p0 = pneg %p1055_p13 }
 0x17c   : > { %p1063_p4 = pnand %p1062_p3, %p1056_p0 }
 0x181   : > { %v637_v45 = vld [vmem:[#allocation3] sm:$0xff] }
 0x182   : > { %v642_v46 = vpack.c.bf16 %v637_v45, %v637_v45 }
 0x184   : > { %967 = vmatmul.mubr.msk.bf16.vlgmr.msra.gmra.mxu1 %vm510_vm1, %v642_v46 }
 0x244   : > { %v699_v50 = vpop.f32.mrf.mxu1 }
 0x245   : > { %v700_v51 = vadd.f32 %v924_v49, %v699_v50 }
 0x246   : > { %v968_v52 = vpop.f32.mrf.mxu1 }
 0x247   : > { %v705_v53 = vmax.f32 %v700_v51, 0.0 }
 0x248   : > { %v702_v54 = vpop.f32.mrf.mxu1 }
 0x249   : > { %v710_v55 = vpack.c.bf16 %v705_v53, %v705_v53 }
 0x24a   : > { %v969_v56 = vpop.f32.mrf.mxu1 }
 0x24b   : > { %975 = vmatmul.mubr.msk.bf16.vlgmr.msra.gmra.mxu0 %vm510_vm1, %v710_v55 }
 0x30b   : > { %v767_v62 = vpop.f32.mrf.mxu0 }
 0x30c   : > { %v768_v0 = vadd.f32 %v928_v60, %v767_v62 }
 0x30d   : > { %v976_v2 = vpop.f32.mrf.mxu0 }
 0x30e   : > { %v784_v3 = vmul.f32 %v783_v63, %v768_v0 }
 0x30f   : > { %v770_v4 = vpop.f32.mrf.mxu0 }
 0x310   : > { %v788_v5 = vadd.f32 %v787_v1, %v784_v3 }
 0x311   : > { %v977_v6 = vpop.f32.mrf.mxu0 }
 0x312   : > { %v789_v7 = vsel %vm510_vm1, %v788_v5, 0.0 }
 0x313   : > { %790 = vadd.xlane.f32.xlu0 %v789_v7 }
 0x39c   : > { %v791_v8 = vpop.xlane.xlu0 %790 }
 0x39d   : > { %v793_v9 = vmul.f32 0.03125, %v791_v8 }
 0x39f   : > { %v794_v10 = vsub.f32 %v788_v5, %v793_v9 }
 0x3a1   : > { %v795_v11 = vmul.f32 %v794_v10, %v794_v10 }
 0x3a3   : > { %v796_v12 = vsel %vm510_vm1, %v795_v11, 0.0 }
 0x3a4   : > { %797 = vadd.xlane.f32.xlu0 %v796_v12 }
 0x42d   : > { %v798_v13 = vpop.xlane.xlu0 %797 }
 0x42e   : > { %v799_v14 = vmul.f32 0.03125, %v798_v13 }
 0x430   : > { %v800_v15 = vadd.f32 1e-06, %v799_v14 }
 0x432   : > { %1051 = vrsqrt.f32 %v800_v15 }
 0x43f   : > { %v1052_v16 = vpop.eup %1051 }
 0x440   : > { %v802_v18 = vmul.f32 %v1052_v16, %v794_v10 }
 0x442   : > { %v810_v20 = vmul.f32 %v933_v17, %v802_v18 }
 0x444   : > { %v818_v21 = vadd.f32 %v934_v19, %v810_v20 }
 0x446   : > { %819 = vst.msk [vmem:[%s486_s28] sm:$0xff] %vm510_vm1, %v818_v21 }
 0x447   : > { %1066 = shalt.err (!%p1063_p4)
}
 0x448   : > { %s1067_s24 = scalar_lea.hbm %s832_s1, 128  ;;  %s1071_s22 = scalar_lea.hbm %s1423_s15, 256 }
 0x449   : > { %p1068_p7 = scmp.ne.s32.totalorder %s832_s1, %s1067_s24  ;;  %p1072_p10 = scmp.lt.s32.totalorder %s832_s1, %s1423_s15 }
 0x44a   : > { %p1073_p11 = scmp.lt.s32.totalorder %s1071_s22, %s1067_s24 }
 0x44b   : > { %p1069_p8 = pnand %p1068_p7, %p1265_p5 }
 0x44c   : > { %p1074_p12 = por %p1073_p11, %p1072_p10 }
 0x44d   : > { %p1070_p9 = pneg %p1069_p8 }
 0x44f   : > { %p1075_p13 = pnand %p1074_p12, %p1070_p9 }
 0x451   : > { %1078 = shalt.err (!%p1075_p13)
}
 0x452   : > { %978 = dma.vmem_to_hbm [thread:$0]  (%p1265_p5), %s835_s26, 128, %s832_s1, %s821_s18  }
 0x453 PF: > { %p984_p0 = scmp.ge.s32.totalorder %s1125_s23, 2  ;;  %s846_s3 = sand.u32 1, %s1113_s20  }
 0x454   : > { %s847_s0 = scalar_lea.sflag [#allocation10], %s846_s3 }
 0x455   : > { %p981_p1 = pnand %p984_p0, %p1269_p6 }
 0x457   : > { %p982_p2 = pneg %p981_p1 }
 0x459   : > { %1108 = dma.done.wait (%p982_p2), %s847_s0, 128  }
 0x45a   : > { %1110 = vsyncadd (%p982_p2), %s847_s0, 4294967168  ;;  %s1437_s2 = sld [smem:[#allocation12_spill]]  ;;  %p26_p3 = scmp.ge.s32.totalorder %s1252_s25, 4  }
 0x45b   : > { %s1438_s22 = sld [smem:[#allocation13_spill]]  ;;  %s1439_s20 = smov %s1117_s21 }
 0x45c   : > { %s1441_s23 = smov %s1252_s25  ;;  %28 = sbr.rel (!%p26_p3) target bundleno = 8 (0x8), region = 137 }
 0x460   : > { %s1440_s21 = smov %s1437_s2 }
 0x461   :  { %852 = vsyncpa [#allocation10], 1 }
 0x462   :  { %854 = vsyncpa [#allocation10 + $0x1], 1 }

</bundles_post_ra>
